<compile_context>
chip_gen: v7x
topology: tpu7x:2x2x1
jax: 0.10.0
libtpu: 0.0.40
codegen_flags: <defaults>
</compile_context>

<pallas_src>
import functools

import jax
import jax.numpy as jnp
from jax import lax
from jax.experimental import pallas as pl
from jax.experimental.pallas import tpu as pltpu

_LANES = 128
_SUBLANE = {4: 8, 2: 16, 1: 32}       # min sublane multiple per itemsize
_NUM_SPLITS = 2                       # v7x: one slice per TensorCore
_CHUNK_ROWS = 1024                    # 512 KiB f32 temp per accumulation chunk
_TARGET_BLOCK_BYTES = 8 << 20         # ~8 MiB of input streamed per grid step
_VMEM_LIMIT_BYTES = 40 * 1024 * 1024  # > v5e 16 MiB scoped default, < v7x 64 MiB


def _rescale_sum_kernel(x_ref, o_ref, *, rows, tile_rows, chunk_rows, n_chunks,
                        tiles_per_core):
    c = pl.program_id(0)          # TensorCore split (parallel)
    i = pl.program_id(1)          # tile within this core's range (arbitrary)
    tile_idx = c * tiles_per_core + i
    row0 = tile_idx * tile_rows

    @pl.when(i == 0)
    def _():
        o_ref[...] = jnp.zeros_like(o_ref)

    def accumulate(masked):
        def body(k, acc):
            start = pl.multiple_of(k * chunk_rows, chunk_rows)
            xc = x_ref[pl.ds(start, chunk_rows), :].astype(jnp.float32)
            if masked:
                rid = (row0 + start) + lax.broadcasted_iota(jnp.int32, xc.shape, 0)
                xc = jnp.where(rid < rows, xc, 0.0)
            # (chunk_rows,128) -> (8,128): pure elementwise vreg adds (VPU).
            return acc + xc.reshape(chunk_rows // 8, 8, _LANES).sum(axis=0)

        return lax.fori_loop(0, n_chunks, body,
                             jnp.zeros((8, _LANES), jnp.float32))

    is_full = row0 + tile_rows <= rows

    # Hot path: full in-range tile, no masking at all.
    @pl.when(is_full)
    def _():
        o_ref[...] += accumulate(masked=False)[None]

    # Ragged final tile (runs at most once per call): masked accumulate.
    # Fully out-of-range tiles (odd tile count) fall through both branches.
    @pl.when(jnp.logical_and(jnp.logical_not(is_full), row0 < rows))
    def _():
        o_ref[...] += accumulate(masked=True)[None]


def rescale_loss(input_arr, target_arr=None, *, scale=1.0):
    """Pallas implementation of RescaleLoss(LossWrapper(), scale)."""
    del target_arr  # base LossWrapper ignores target, as in the reference

    if jnp.dtype(input_arr.dtype).itemsize not in _SUBLANE:
        # TODO(synk): f64 on TPU is an edge case; sum in f32 instead.
        input_arr = input_arr.astype(jnp.float32)

    dtype = input_arr.dtype
    itemsize = jnp.dtype(dtype).itemsize
    sublane = _SUBLANE[itemsize]

    flat = input_arr.reshape(-1)          # free (contiguous) reshape
    n = flat.shape[0]

    rows = n // _LANES
    rem = n - rows * _LANES

    if rows == 0:
        # Degenerate tiny input (< 128 elements): pad to one minimum tile.
        pad = sublane * _LANES - n
        flat = jnp.concatenate([flat, jnp.zeros((pad,), dtype=dtype)])
        rows, rem = sublane, 0

    rem_sum = None
    if rem:
        # Rare for NN shapes: <128-element lane tail summed by XLA.
        rem_sum = jnp.sum(flat[rows * _LANES:].astype(jnp.float32))
        flat = flat[: rows * _LANES]

    x2d = flat.reshape(rows, _LANES)      # lane-dense (rows, 128) slab

    # Tile sizing: ~8 MiB of input per step, chunked internally so the f32
    # temporary stays ~0.5 MiB even for bf16/int8 inputs.
    if rows <= _CHUNK_ROWS:
        chunk_rows = tile_rows = ((rows + sublane - 1) // sublane) * sublane
    else:
        chunk_rows = _CHUNK_ROWS
        target_rows = ((_TARGET_BLOCK_BYTES // (_LANES * itemsize))
                       // chunk_rows * chunk_rows)
        tile_rows = min(max(chunk_rows, target_rows),
                        (rows // chunk_rows) * chunk_rows)
    n_chunks = tile_rows // chunk_rows

    num_tiles = pl.cdiv(rows, tile_rows)
    tiles_per_core = pl.cdiv(num_tiles, _NUM_SPLITS)
    grid = (_NUM_SPLITS, tiles_per_core)

    def x_index_map(c, i):
        # Clamp: with an odd tile count the last (fully OOB) tile of core 1
        # re-reads the final valid block; the kernel gates its accumulate off.
        return (jnp.minimum(c * tiles_per_core + i, num_tiles - 1), 0)

    kernel = functools.partial(
        _rescale_sum_kernel, rows=rows, tile_rows=tile_rows,
        chunk_rows=chunk_rows, n_chunks=n_chunks, tiles_per_core=tiles_per_core)

    partials = pl.pallas_call(
        kernel,
        out_shape=jax.ShapeDtypeStruct((_NUM_SPLITS, 8, _LANES), jnp.float32),
        grid_spec=pltpu.PrefetchScalarGridSpec(
            num_scalar_prefetch=0,
            grid=grid,
            in_specs=[pl.BlockSpec((tile_rows, _LANES), x_index_map)],
            out_specs=pl.BlockSpec((1, 8, _LANES), lambda c, i: (c, 0, 0)),
        ),
        compiler_params=pltpu.CompilerParams(
            dimension_semantics=("parallel", "arbitrary"),
            vmem_limit_bytes=_VMEM_LIMIT_BYTES,
        ),
        cost_estimate=pl.CostEstimate(
            flops=n, transcendentals=0, bytes_accessed=n * itemsize),
    )(x2d)

    total = jnp.sum(partials)             # 2*8*128 floats: trivial XLA reduce
    if rem_sum is not None:
        total = total + rem_sum
    return total * jnp.float32(scale)


if __name__ == "__main__":
    key = jax.random.PRNGKey(0)
    k_in, k_tgt = jax.random.split(key)

    # Small NCHW shapes consistent with a model output fed to a loss.
    x = jax.random.normal(k_in, (2, 4, 16, 16), dtype=jnp.float32)
    target = jax.random.normal(k_tgt, (2, 4, 16, 16), dtype=jnp.float32)
    scale = 0.5

    out = rescale_loss(x, target, scale=scale)
    out = jax.block_until_ready(out)

    ref = jnp.sum(x) * scale
    assert jnp.allclose(out, ref, rtol=1e-5, atol=1e-5), (out, ref)
    print("KERNEL_OK")
</pallas_src>

<mosaic_0001>
module attributes {stable_mosaic.version = 11 : i64} {
  func.func @_rescale_sum_kernel(%arg0: i32, %arg1: i32, %arg2: memref<16x128xf32, #tpu.memory_space<vmem>>, %arg3: memref<1x8x128xf32, #tpu.memory_space<vmem>>) attributes {dimension_semantics = [#tpu.dimension_semantics<parallel>, #tpu.dimension_semantics<arbitrary>], iteration_bounds = array<i64: 2, 1>, scalar_prefetch = 0 : i64, scratch_operands = 0 : i64, tpu.core_type = #tpu.core_type<tc>, window_params = [{transform_indices = @transform_0, window_bounds = array<i64: 16, 128>}, {transform_indices = @transform_1, window_bounds = array<i64: 1, 8, 128>}]} {
    %c1_i32 = arith.constant 1 : i32
    %0 = arith.muli %arg0, %c1_i32 : i32
    %1 = arith.addi %0, %arg1 : i32
    %c16_i32 = arith.constant 16 : i32
    %2 = arith.muli %1, %c16_i32 : i32
    %c0_i32 = arith.constant 0 : i32
    %3 = arith.cmpi eq, %arg1, %c0_i32 : i32
    %4 = arith.extui %3 : i1 to i32
    %c0_i32_0 = arith.constant 0 : i32
    %5 = arith.cmpi ne, %4, %c0_i32_0 : i32
    scf.if %5 {
      %cst = arith.constant 0.000000e+00 : f32
      %15 = vector.broadcast %cst : f32 to vector<1x8x128xf32>
      %c0 = arith.constant 0 : index
      %c0_6 = arith.constant 0 : index
      %c0_7 = arith.constant 0 : index
      %16 = vector.load %arg3[%c0, %c0_6, %c0_7] : memref<1x8x128xf32, #tpu.memory_space<vmem>>, vector<1x8x128xf32>
      tpu.vector_store %arg3[%c0, %c0_6, %c0_7], %15 {strides = array<i32>} : memref<1x8x128xf32, #tpu.memory_space<vmem>>, vector<1x8x128xf32>,
    } else {
    }
    %c16_i32_1 = arith.constant 16 : i32
    %6 = arith.addi %2, %c16_i32_1 : i32
    %c16_i32_2 = arith.constant 16 : i32
    %7 = arith.cmpi sle, %6, %c16_i32_2 : i32
    %8 = arith.extui %7 : i1 to i32
    %c0_i32_3 = arith.constant 0 : i32
    %9 = arith.cmpi ne, %8, %c0_i32_3 : i32
    scf.if %9 {
      %c0 = arith.constant 0 : index
      %c0_6 = arith.constant 0 : index
      %c0_7 = arith.constant 0 : index
      %15 = vector.load %arg3[%c0, %c0_6, %c0_7] : memref<1x8x128xf32, #tpu.memory_space<vmem>>, vector<1x8x128xf32>
      %cst = arith.constant 0.000000e+00 : f32
      %16 = vector.broadcast %cst : f32 to vector<8x128xf32>
      %c0_i32_8 = arith.constant 0 : i32
      %c16_i32_9 = arith.constant 16 : i32
      %17 = arith.muli %c0_i32_8, %c16_i32_9 : i32
      %18 = tpu.assume_multiple %17, 16 : i32
      %19 = arith.index_cast %18 : i32 to index
      %c0_10 = arith.constant 0 : index
      %20 = vector.load %arg2[%19, %c0_10] : memref<16x128xf32, #tpu.memory_space<vmem>>, vector<16x128xf32>
      %21 = vector.shape_cast %20 : vector<16x128xf32> to vector<2x8x128xf32>
      %cst_11 = arith.constant dense<0.000000e+00> : vector<8x128xf32>
      %22 = vector.multi_reduction <add>, %21, %cst_11 [0] : vector<2x8x128xf32> to vector<8x128xf32>
      %23 = arith.addf %16, %22 : vector<8x128xf32>
      %c1_i32_12 = arith.constant 1 : i32
      %24 = vector.shape_cast %23 : vector<8x128xf32> to vector<1x8x128xf32>
      %25 = arith.addf %15, %24 : vector<1x8x128xf32>
      %c0_13 = arith.constant 0 : index
      %c0_14 = arith.constant 0 : index
      %c0_15 = arith.constant 0 : index
      %26 = vector.load %arg3[%c0_13, %c0_14, %c0_15] : memref<1x8x128xf32, #tpu.memory_space<vmem>>, vector<1x8x128xf32>
      tpu.vector_store %arg3[%c0_13, %c0_14, %c0_15], %25 {strides = array<i32>} : memref<1x8x128xf32, #tpu.memory_space<vmem>>, vector<1x8x128xf32>,
    } else {
    }
    %true = arith.constant true
    %10 = arith.xori %7, %true : i1
    %c16_i32_4 = arith.constant 16 : i32
    %11 = arith.cmpi slt, %2, %c16_i32_4 : i32
    %12 = arith.andi %10, %11 : i1
    %13 = arith.extui %12 : i1 to i32
    %c0_i32_5 = arith.constant 0 : i32
    %14 = arith.cmpi ne, %13, %c0_i32_5 : i32
    scf.if %14 {
      %c0 = arith.constant 0 : index
      %c0_6 = arith.constant 0 : index
      %c0_7 = arith.constant 0 : index
      %15 = vector.load %arg3[%c0, %c0_6, %c0_7] : memref<1x8x128xf32, #tpu.memory_space<vmem>>, vector<1x8x128xf32>
      %cst = arith.constant 0.000000e+00 : f32
      %16 = vector.broadcast %cst : f32 to vector<8x128xf32>
      %c0_i32_8 = arith.constant 0 : i32
      %c16_i32_9 = arith.constant 16 : i32
      %17 = arith.muli %c0_i32_8, %c16_i32_9 : i32
      %18 = tpu.assume_multiple %17, 16 : i32
      %19 = arith.index_cast %18 : i32 to index
      %c0_10 = arith.constant 0 : index
      %20 = vector.load %arg2[%19, %c0_10] : memref<16x128xf32, #tpu.memory_space<vmem>>, vector<16x128xf32>
      %21 = arith.addi %2, %18 : i32
      %22 = tpu.iota {dimensions = array<i32: 0>} : vector<16x128xi32>
      %23 = vector.broadcast %21 : i32 to vector<16x128xi32>
      %24 = arith.addi %23, %22 : vector<16x128xi32>
      %c16_i32_11 = arith.constant 16 : i32
      %25 = vector.broadcast %c16_i32_11 : i32 to vector<16x128xi32>
      %26 = arith.cmpi slt, %24, %25 : vector<16x128xi32>
      %cst_12 = arith.constant 0.000000e+00 : f32
      %27 = vector.broadcast %cst_12 : f32 to vector<16x128xf32>
      %28 = arith.select %26, %20, %27 : vector<16x128xi1>, vector<16x128xf32>
      %29 = vector.shape_cast %28 : vector<16x128xf32> to vector<2x8x128xf32>
      %cst_13 = arith.constant dense<0.000000e+00> : vector<8x128xf32>
      %30 = vector.multi_reduction <add>, %29, %cst_13 [0] : vector<2x8x128xf32> to vector<8x128xf32>
      %31 = arith.addf %16, %30 : vector<8x128xf32>
      %c1_i32_14 = arith.constant 1 : i32
      %32 = vector.shape_cast %31 : vector<8x128xf32> to vector<1x8x128xf32>
      %33 = arith.addf %15, %32 : vector<1x8x128xf32>
      %c0_15 = arith.constant 0 : index
      %c0_16 = arith.constant 0 : index
      %c0_17 = arith.constant 0 : index
      %34 = vector.load %arg3[%c0_15, %c0_16, %c0_17] : memref<1x8x128xf32, #tpu.memory_space<vmem>>, vector<1x8x128xf32>
      tpu.vector_store %arg3[%c0_15, %c0_16, %c0_17], %33 {strides = array<i32>} : memref<1x8x128xf32, #tpu.memory_space<vmem>>, vector<1x8x128xf32>,
    } else {
    }
    return
  }
  func.func @transform_0(%arg0: i32, %arg1: i32) -> (i32, i32) {
    %c1_i32 = arith.constant 1 : i32
    %0 = arith.muli %arg0, %c1_i32 : i32
    %1 = arith.addi %0, %arg1 : i32
    %c0_i32 = arith.constant 0 : i32
    %2 = arith.minsi %1, %c0_i32 : i32
    %c0_i32_0 = arith.constant 0 : i32
    %c0_i32_1 = arith.constant 0 : i32
    return %2, %c0_i32_0 : i32, i32
  }
  func.func @transform_1(%arg0: i32, %arg1: i32) -> (i32, i32, i32) {
    %c0_i32 = arith.constant 0 : i32
    %c0_i32_0 = arith.constant 0 : i32
    %c0_i32_1 = arith.constant 0 : i32
    return %arg0, %c0_i32, %c0_i32_0 : i32, i32, i32
  }
}

</mosaic_0001>

<bundles_post_ra>
// kernel: tpu_custom_call.1
= control target key start
LH: loop header
LB: loop body
LE: loop exit
PB: predicated region body
PF: predicated region fallthrough
CT: control target
= control target key end

     0   :  { %6 = vsyncpa [#allocation3], 0  ;;  %s719_s0 = inlined_call_operand.hbm [shape: f32[16,128], index: 0, kind: input, shape index: {}]   ;;  %s720_s1 = inlined_call_operand.hbm [shape: f32[2,8,128], index: 1, kind: output, shape index: {}]  }
   0x1   :  { %8 = vsyncpa [#allocation3 + $0x1], 0 }
   0x2   :  { %9 = vsyncpa [#allocation4], 0 }
   0x3   :  { %11 = vsyncpa [#allocation4 + $0x1], 0  ;;  %s551_s6 = smov 0   ;;  %s553_s7 = smov 0  }
   0x4   :  { %s555_s8 = smov 0   ;;  %s557_s9 = smov 0  }
   0x5   :  { %s559_s10 = smov 0   ;;  %s561_s11 = smov 0  }
   0x6   :  { %s563_s12 = smov 0   ;;  %s565_s13 = smov 0  }
   0x7 LB: > { %s295_s14 = sadd.s32 4294967295, %s534_s13   ;;  %s296_s15 = sadd.s32 4294967294, %s534_s13   ;;  %s534_s13 = sphi %s565_s13, %s17_s13   ;;  %s530_s12 = sphi %s563_s12, %s739_s12   ;;  %s526_s11 = sphi %s561_s11, %s738_s11   ;;  %s522_s10 = sphi %s559_s10, %s709_s10   ;;  %s518_s9 = sphi %s557_s9, %s737_s9   ;;  %s514_s8 = sphi %s555_s8, %s736_s8   ;;  %s510_s7 = sphi %s553_s7, %s735_s7   ;;  %s506_s6 = sphi %s551_s6, %s734_s6  }
   0x8   : > { %s29_s16 = sadd.s32 1, %s530_s12  ;;  %p503_p1 = scmp.ne.s32.totalorder %s522_s10, 0 }
   0x9   : > { %p31_p0 = scmp.ge.s32.totalorder %s29_s16, 2  ;;  %p50_p2 = scmp.eq.s32.totalorder %s534_s13, 0 }
   0xa   : > { %p55_p3 = scmp.ne.s32.totalorder %s522_s10, %s518_s9  ;;  %p56_p5 = scmp.eq.s32.totalorder %s295_s14, 0 }
   0xb   : > { %s741_s16 = smov (%p31_p0, %s29_s16), 0  ;;  %p597_p4 = por %p503_p1, %p50_p2 }
   0xc   : > { %p601_p6 = por %p56_p5, %p55_p3  ;;  %s65_s19 = ssub.s32 %s530_s12, %s741_s16 }
   0xd   : > { %p66_p7 = scmp.eq.s32.totalorder %s65_s19, 0  ;;  %s68_s20 = sadd.s32 1, %s514_s8 }
   0xe   : > { %s725_s18 = scalar_select %p601_p6, 1, 0 }
   0xf   : > { %s609_s21 = scalar_select %p66_p7, %s514_s8, %s68_s20  }
  0x10   : > { %p78_p8 = scmp.ne.s32.totalorder %s514_s8, %s510_s7  ;;  %p79_p9 = scmp.eq.s32.totalorder %s295_s14, 1 }
  0x11   : > { %p84_p10 = scmp.ne.s32.totalorder %s510_s7, %s506_s6  ;;  %p85_p11 = scmp.eq.s32.totalorder %s296_s15, 1 }
  0x12   : > { %p615_p12 = por %p79_p9, %p78_p8  ;;  %p324_p1 = scmp.lt.s32.totalorder %s534_s13, 2 }
  0x13   : > { %p620_p0 = por %p85_p11, %p84_p10  ;;  %s536_s24 = smov [#allocation2]  }
  0x14   : > { %s726_s22 = scalar_select %p615_p12, 1, 0 }
  0x15   : > { %s727_s23 = scalar_select %p620_p0, 1, 0 }
  0x16   : > { %s119_s25 = sshll.u32 %s536_s24, 4  ;;  %p627_p2 = pnand %p324_p1, %p597_p4  ;;  %s120_s25 = int_to_ptr.vmem [resolvable:$true] %s119_s25 }
  0x17   : > { %s401_s29 = scalar_lea.hbm %s719_s0, 256 }
  0x18   : > { %s728_s26 = scalar_select %p627_p2, 1, 0 }
  0x19   : > { %p402_p3 = scmp.ne.s32.totalorder %s719_s0, %s401_s29  ;;  %p403_p5 = pneg %p627_p2 }
  0x1a   : > { %p408_p9 = scmp.lt.u32.totalorder %s401_s29, %s401_s29  ;;  %p410_p4 = scmp.lt.u32.totalorder %s401_s29, %s719_s0 }
  0x1b   : > { %p404_p7 = pnand %p403_p5, %p402_p3 }
  0x1c   : > { %p411_p10 = por %p410_p4, %p408_p9 }
  0x1d   : > { %p405_p8 = pneg %p404_p7 }
  0x1f   : > { %p412_p11 = pnand %p411_p10, %p405_p8 }
  0x21   : > { %415 = shalt.err (!%p412_p11)
}
  0x22   : > { %s416_s5 = scalar_lea.vmem %s120_s25, 256  ;;  %s423_s9 = scalar_lea.vmem %s120_s25, 512 }
  0x23   : > { %p417_p1 = scmp.ne.s32.totalorder %s120_s25, %s416_s5  ;;  %p424_p12 = scmp.lt.s32.totalorder %s120_s25, %s120_s25 }
  0x24   : > { %p425_p6 = scmp.lt.s32.totalorder %s423_s9, %s416_s5 }
  0x25   : > { %p419_p13 = pnand %p417_p1, %p403_p5 }
  0x26   : > { %p426_p2 = por %p425_p6, %p424_p12 }
  0x27   : > { %p420_p0 = pneg %p419_p13 }
  0x29   : > { %p427_p3 = pnand %p426_p2, %p420_p0 }
  0x2b   : > { %430 = shalt.err (!%p427_p3)
}
  0x2c   : > { %s537_s14 = smov 128   ;;  %s538_s15 = smov 8  }
  0x2d   : > { %p729_p7 = scmp.ne.s32.totalorder %s728_s26, 0  ;;  %p302_p8 = scmp.ge.s32.totalorder %s534_s13, 1 }
  0x2e   : > { %p127_p9 = scmp.lt.s32.totalorder %s534_s13, 3 }
  0x2f   : > { %319 = dma.hbm_to_vmem [thread:$0]  (!%p729_p7), %s719_s0, 256, %s120_s25, [#allocation3], %s537_s14, %s537_s14, %s538_s15  }
  0x30   : > { %p128_p5 = pnand %p302_p8, %p127_p9 }
  0x31   : > { %s133_s20 = sand.u32 (!%p128_p5), 1, %s522_s10   ;;  %p730_p6 = scmp.ne.s32.totalorder (!%p128_p5), %s725_s18, 0 }
  0x32   : > { %131 = sbr.rel (%p128_p5) target bundleno = 115 (0x73), region = 24  ;;  %s303_s24 = sshll.u32 (!%p128_p5), %s133_s20, 4 }
  0x33   : > { %s134_s27 = scalar_lea.sflag (!%p128_p5), [#allocation3], %s133_s20  ;;  %s137_s28 = scalar_lea.vmem (!%p128_p5), [#allocation2], %s303_s24 }
  0x39   : > { %496 = dma.done.wait (%p730_p6), %s134_s27, 256  }
  0x3a   : > { %498 = vsyncadd (%p730_p6), %s134_s27, 4294967040  ;;  %s153_s26 = sand.u32 1, %s510_s7   ;;  %s305_s25 = sshll.u32 %s526_s11, 4  ;;  %v539_v0 = vmov 0.0  }
  0x3b   : > { %s304_s29 = sshll.u32 %s153_s26, 3  ;;  %s167_s30 = sadd.s32 16, %s305_s25 }
  0x3c   : > { %s658_s2 = scalar_lea.vmem [#allocation5], %s304_s29  ;;  %p306_p12 = scmp.gt.s32.totalorder %s167_s30, 16 }
  0x3d   : > { %166 = vst [vmem:[%s658_s2] sm:$0xff] %v539_v0  ;;  %v173_v2 = vld [vmem:[%s137_s28] sm:$0xff] (!%p306_p12)  ;;  %v174_v3 = vld [vmem:[%s137_s28 + $0x8] sm:$0xff] (!%p306_p12) }
  0x3e   : > { %171 = sbr.rel (%p306_p12) target bundleno = 72 (0x48), region = 36  ;;  %v175_v4 = vadd.f32 (!%p306_p12), %v174_v3, %v173_v2 }
  0x44   : > { %v172_v1 = vld [vmem:[%s658_s2] sm:$0xff] (!%p306_p12) }
  0x45   : > { %v177_v5 = vadd.f32 %v175_v4, %v172_v1 }
  0x47   : > { %178 = vst [vmem:[%s658_s2] sm:$0xff] %v177_v5 }
  0x48 PF: > { %p180_p13 = scmp.lt.s32.totalorder %s305_s25, 16 }
  0x4a   : > { %p181_p0 = pnand %p306_p12, %p180_p13 }
  0x4b   : > { %v189_v6 = vlaneseq (!%p181_p0)  ;;  %v192_v7 = vstv (!%p181_p0), %s305_s25  ;;  %v186_v9 = vld [vmem:[%s137_s28] sm:$0xff] (!%p181_p0)  ;;  %v187_v12 = vld [vmem:[%s137_s28 + $0x8] sm:$0xff] (!%p181_p0) }
  0x4c   : > { %184 = sbr.rel (%p181_p0) target bundleno = 90 (0x5a), region = 40 }
  0x4d   : > { %v190_v8 = vshrl.u32 (!%p181_p0), %v189_v6, 7 }
  0x4e   : > { %v185_v15 = vld [vmem:[%s658_s2] sm:$0xff] (!%p181_p0) }
  0x4f   : > { %v191_v10 = vadd.s32 (!%p181_p0), 8, %v190_v8  ;;  %v193_v11 = vadd.s32 (!%p181_p0), %v192_v7, %v190_v8 }
  0x51   : > { %v194_v13 = vadd.s32 (!%p181_p0), %v192_v7, %v191_v10  ;;  %vm195_vm0 = vcmp.lt.s32.totalorder (!%p181_p0), %v193_v11, 16 }
  0x52   : > { %v197_v14 = vsel (!%p181_p0), %vm195_vm0, %v186_v9, 0.0 }
  0x53   : > { %vm196_vm1 = vcmp.lt.s32.totalorder %v194_v13, 16 }
  0x54   : > { %v198_v16 = vsel %vm196_vm1, %v187_v12, 0.0 }
  0x55   : > { %v199_v17 = vadd.f32 %v198_v16, %v197_v14 }
  0x57   : > { %v201_v18 = vadd.f32 %v199_v17, %v185_v15 }
  0x59   : > { %202 = vst [vmem:[%s658_s2] sm:$0xff] %v201_v18 }
  0x5a PF: > { %s308_s18 = sshll.u32 %s526_s11, 7  ;;  %s217_s9 = sshll.u32 %s658_s2, 4  ;;  %s218_s9 = int_to_ptr.vmem [resolvable:$true] %s217_s9 }
  0x5b   : > { %s669_s5 = scalar_lea.hbm %s720_s1, %s308_s18  ;;  %s204_s14 = scalar_lea.sflag [#allocation4], %s153_s26 }
  0x5c   : > { %s431_s15 = scalar_lea.vmem %s218_s9, 128  ;;  %p731_p4 = scmp.ne.s32.totalorder %s726_s22, 0 }
  0x5d   : > { %p432_p2 = scmp.ne.s32.totalorder %s218_s9, %s431_s15  ;;  %s540_s17 = smov [#allocation5]  }
  0x5e   : > { %s435_s19 = sshll.u32 %s540_s17, 4  ;;  %s436_s19 = int_to_ptr.vmem [resolvable:$false] %s435_s19 }
  0x5f   : > { %p433_p10 = pnand %p432_p2, %p731_p4  ;;  %s437_s20 = scalar_lea.vmem %s436_s19, 256 }
  0x60   : > { %p438_p1 = scmp.lt.s32.totalorder %s218_s9, %s436_s19  ;;  %p439_p3 = scmp.lt.s32.totalorder %s437_s20, %s431_s15 }
  0x61   : > { %p434_p11 = pneg %p433_p10 }
  0x62   : > { %p440_p7 = por %p439_p3, %p438_p1 }
  0x64   : > { %p441_p8 = pnand %p440_p7, %p434_p11 }
  0x66   : > { %444 = shalt.err (!%p441_p8)
}
  0x67   : > { %s445_s11 = scalar_lea.hbm %s669_s5, 128  ;;  %s449_s28 = scalar_lea.hbm %s720_s1, 256 }
  0x68   : > { %p446_p9 = scmp.ne.s32.totalorder %s669_s5, %s445_s11  ;;  %p450_p12 = scmp.lt.u32.totalorder %s669_s5, %s720_s1 }
  0x69   : > { %p451_p13 = scmp.lt.u32.totalorder %s449_s28, %s445_s11  ;;  %p453_p2 = scmp.lt.u32.totalorder %s445_s11, %s669_s5 }
  0x6a   : > { %p447_p5 = pnand %p446_p9, %p731_p4 }
  0x6b   : > { %p452_p0 = por %p451_p13, %p450_p12 }
  0x6c   : > { %p448_p6 = pneg %p447_p5 }
  0x6d   : > { %p454_p10 = por %p453_p2, %p452_p0 }
  0x6f   : > { %p455_p11 = pnand %p454_p10, %p448_p6 }
  0x71   : > { %458 = shalt.err (!%p455_p11)
}
  0x72   : > { %314 = dma.vmem_to_hbm [thread:$0]  (%p731_p4), %s218_s9, 128, %s669_s5, %s204_s14  }
  0x73 PF: > { %s229_s29 = sand.u32 1, %s506_s6   ;;  %p732_p1 = scmp.ne.s32.totalorder %s727_s23, 0 }
  0x74   : > { %p733_p3 = scmp.ge.s32.totalorder %s534_s13, 2  ;;  %s230_s30 = scalar_lea.sflag [#allocation4], %s229_s29 }
  0x76   : > { %p321_p7 = pnand %p733_p3, %p732_p1 }
  0x78   : > { %500 = dma.done.wait (!%p321_p7), %s230_s30, 128  }
  0x79   : > { %502 = vsyncadd (!%p321_p7), %s230_s30, 4294967168  ;;  %s17_s13 = sadd.s32 1, %s534_s13   ;;  %s734_s6 = smov %s510_s7 }
  0x7a   : > { %p14_p8 = scmp.ge.s32.totalorder %s17_s13, 4   ;;  %s735_s7 = smov %s514_s8 }
  0x7b   : > { %s736_s8 = smov %s609_s21  ;;  %s737_s9 = smov %s522_s10 }
  0x7c   : > { %s709_s10 = smov 0   ;;  %s738_s11 = smov %s530_s12 }
  0x7d   : > { %s739_s12 = smov %s741_s16  ;;  %16 = sbr.rel (!%p14_p8) target bundleno = 7 (0x7), region = 81 }
  0x84   :  { %235 = vsyncpa [#allocation3], 1 }
  0x85   :  { %237 = vsyncpa [#allocation3 + $0x1], 1 }
  0x86   :  { %238 = vsyncpa [#allocation4], 1 }
  0x87   :  { %240 = vsyncpa [#allocation4 + $0x1], 1 }

</bundles_post_ra>
